<compile_context>
chip_gen: v5e
topology: v5e:2x2
jax: 0.10.0
libtpu: 0.0.40
codegen_flags: <defaults>
</compile_context>

<pallas_src>
import math
from functools import partial

import jax
import jax.numpy as jnp
from jax.experimental import pallas as pl
from jax.experimental.pallas import tpu as pltpu


# ----------------------------- slab layout helpers ---------------------------

_BLOCK_ROWS = 512            # rows per pipelined tile: 512x512 f32 = 1 MiB
_BLOCK_S = 1024              # sublane tile for the per-channel clamp path
_VMEM_LIMIT = 32 * 1024 * 1024


def _round_up(x, m):
    return -(-x // m) * m


def _to_slab(x):
    """Flatten to a lane-dense (rows, lanes) slab without padding when possible."""
    total = x.size
    flat = x.reshape(-1)
    lanes = None
    for cand in (512, 256, 128):
        if total % cand == 0:
            lanes = cand
            break
    if lanes is None:                       # rare: pad minimally to 128 lanes
        lanes = 128
        padded = _round_up(total, lanes)
        flat = jnp.pad(flat, (0, padded - total))
    rows = flat.size // lanes
    return flat.reshape(rows, lanes), total


def _from_slab(slab, total, shape):
    if slab.size == total:
        return slab.reshape(shape)
    return slab.reshape(-1)[:total].reshape(shape)


def _pick_block_rows(rows, multiple):
    """Block sublane extent: full rows when small, else a multiple of `multiple`."""
    if rows <= multiple:
        return rows
    return min(_BLOCK_ROWS, (rows // multiple) * multiple)


def _elementwise_call(kernel, out_dtype, slabs, row_multiple=8):
    """Tiled, pipelined elementwise pallas_call over same-shape slabs."""
    rows, lanes = slabs[0].shape
    block_rows = _pick_block_rows(rows, row_multiple)
    spec = pl.BlockSpec((block_rows, lanes), lambda i: (i, 0))
    return pl.pallas_call(
        kernel,
        out_shape=jax.ShapeDtypeStruct((rows, lanes), out_dtype),
        grid=(pl.cdiv(rows, block_rows),),
        in_specs=[spec] * len(slabs),
        out_specs=spec,
        compiler_params=pltpu.CompilerParams(
            dimension_semantics=("parallel",),
            vmem_limit_bytes=_VMEM_LIMIT,
        ),
    )(*slabs)


# ------------------------------- Pallas kernels ------------------------------

def _make_freeze_clamp_kernel(lo, hi):
    """learned = where(mask, target, learned), optionally fused with clamp."""
    def kernel(m_ref, t_ref, x_ref, o_ref):
        v = jnp.where(m_ref[...] != 0, t_ref[...], x_ref[...])
        if lo is not None:
            v = jnp.maximum(v, jnp.asarray(lo, v.dtype))
        if hi is not None:
            v = jnp.minimum(v, jnp.asarray(hi, v.dtype))
        o_ref[...] = v
    return kernel


def _make_clamp_kernel(lo, hi):
    def kernel(x_ref, o_ref):
        v = x_ref[...]
        if lo is not None:
            v = jnp.maximum(v, jnp.asarray(lo, v.dtype))
        if hi is not None:
            v = jnp.minimum(v, jnp.asarray(hi, v.dtype))
        o_ref[...] = v
    return kernel


def _lerp_kernel(f_ref, x_ref, p_ref, o_ref):
    # torch lerp_: self = self + frac * (prior - self); frac lives in SMEM.
    a = x_ref[...]
    f = f_ref[0].astype(a.dtype)
    o_ref[...] = a + f * (p_ref[...] - a)


def _perchannel_clamp_kernel(lo_ref, hi_ref, x_ref, o_ref):
    # lo/hi are (C,) f32 in SMEM; channel index comes from the grid.
    ch = pl.program_id(1)
    v = x_ref[...]
    lo = lo_ref[ch].astype(v.dtype)
    hi = hi_ref[ch].astype(v.dtype)
    o_ref[...] = jnp.minimum(jnp.maximum(v, lo), hi)


# --------------------------------- wrappers -----------------------------------

@partial(jax.jit, static_argnames=("lo", "hi"))
def _freeze_pallas(copy_mask, target_image, learned, lo=None, hi=None):
    mask_i8 = (copy_mask != 0).astype(jnp.int8)     # 1 byte/elem of DMA traffic
    m_slab, total = _to_slab(mask_i8)
    t_slab, _ = _to_slab(target_image)
    l_slab, _ = _to_slab(learned)
    out = _elementwise_call(_make_freeze_clamp_kernel(lo, hi), learned.dtype,
                            (m_slab, t_slab, l_slab), row_multiple=32)
    return _from_slab(out, total, learned.shape)


@partial(jax.jit, static_argnames=("lo", "hi"))
def _clamp_pallas(x, lo=None, hi=None):
    slab, total = _to_slab(x)
    out = _elementwise_call(_make_clamp_kernel(lo, hi), x.dtype, (slab,))
    return _from_slab(out, total, x.shape)


@jax.jit
def _lerp_pallas(x, prior, fraction):
    x_slab, total = _to_slab(x)
    p_slab, _ = _to_slab(prior)
    frac = jnp.asarray(fraction, dtype=jnp.float32).reshape((1,))
    rows, lanes = x_slab.shape
    block_rows = _pick_block_rows(rows, 8)
    spec = pl.BlockSpec((block_rows, lanes), lambda i: (i, 0))
    out = pl.pallas_call(
        _lerp_kernel,
        out_shape=jax.ShapeDtypeStruct((rows, lanes), x.dtype),
        grid=(pl.cdiv(rows, block_rows),),
        in_specs=[pl.BlockSpec(memory_space=pltpu.MemorySpace.SMEM), spec, spec],
        out_specs=spec,
        compiler_params=pltpu.CompilerParams(
            dimension_semantics=("parallel",),
            vmem_limit_bytes=_VMEM_LIMIT,
        ),
    )(frac, x_slab, p_slab)
    return _from_slab(out, total, x.shape)


@jax.jit
def _clamp_perchannel_pallas(x, lo_arr, hi_arr):
    """Single-launch per-channel clamp: grid over (N, C, spatial tiles).

    Limits live in SMEM so new limit values never trigger a recompile.
    """
    n, c, h, w = x.shape
    hw = h * w
    smem_spec = pl.BlockSpec(memory_space=pltpu.MemorySpace.SMEM)
    cp = pltpu.CompilerParams(
        dimension_semantics=("parallel", "parallel", "parallel"),
        vmem_limit_bytes=_VMEM_LIMIT,
    )

    if hw % 128 == 0:
        # Free minor-dim reshape to a lane-dense (N, C, HW/128, 128) view.
        s = hw // 128
        x4 = x.reshape(n, c, s, 128)
        bs = _pick_block_rows(s, 8) if s > 8 else s
        bs = min(bs, _BLOCK_S)
        spec = pl.BlockSpec((1, 1, bs, 128), lambda ni, ci, ki: (ni, ci, ki, 0))
        out = pl.pallas_call(
            _perchannel_clamp_kernel,
            out_shape=jax.ShapeDtypeStruct((n, c, s, 128), x.dtype),
            grid=(n, c, pl.cdiv(s, bs)),
            in_specs=[smem_spec, smem_spec, spec],
            out_specs=spec,
            compiler_params=cp,
        )(lo_arr, hi_arr, x4)
        return out.reshape(n, c, h, w)

    # Fallback: operate directly on NCHW (full-width last dim block is allowed).
    bh = h if h <= 8 else min(_BLOCK_ROWS, (h // 8) * 8)
    spec = pl.BlockSpec((1, 1, bh, w), lambda ni, ci, ki: (ni, ci, ki, 0))
    return pl.pallas_call(
        _perchannel_clamp_kernel,
        out_shape=jax.ShapeDtypeStruct((n, c, h, w), x.dtype),
        grid=(n, c, pl.cdiv(h, bh)),
        in_specs=[smem_spec, smem_spec, spec],
        out_specs=spec,
        compiler_params=cp,
    )(lo_arr, hi_arr, x)


# ------------------------------ MetamerImage ----------------------------------

class MetamerImage:
    """JAX/Pallas port of the PyTorch MetamerImage module."""

    def __init__(self, seed_image):
        if seed_image.ndim == 3:
            seed_image = seed_image[None]            # unsqueeze(0) -> NCHW
        self.learned = seed_image
        self.frozen_mask = None
        self.loss_value = math.nan
        self.pooling_loss_image = None
        self.blame_image = None
        self.statgroup_loss_images = None

    # -- forward path: pure parameter read, no kernel / no copy --
    def forward(self):
        return self.learned

    def __call__(self):
        return self.forward()

    # -- elementwise utilities implemented with Pallas kernels --
    def copy_and_freeze_pixels_(self, target_image, copy_mask,
                                lower_limit=None, upper_limit=None):
        # Optional lower/upper limit fuse the clamp into the same HBM pass.
        lo = None if lower_limit is None else float(lower_limit)
        hi = None if upper_limit is None else float(upper_limit)
        self.learned = _freeze_pallas(copy_mask, target_image, self.learned,
                                      lo=lo, hi=hi)
        self.frozen_mask = copy_mask

    def set_frozen_mask(self, freeze_mask):
        self.frozen_mask = freeze_mask

    def clamp_range_(self, lower_limit, upper_limit):
        if lower_limit is None and upper_limit is None:
            return
        if isinstance(lower_limit, list) or isinstance(upper_limit, list):
            c = self.learned.shape[-3]

            def pick(lim, i, default):
                v = lim[i] if isinstance(lim, list) else lim
                return default if v is None else float(v)

            lo_arr = jnp.asarray(
                [pick(lower_limit, i, float("-inf")) for i in range(c)],
                dtype=jnp.float32)
            hi_arr = jnp.asarray(
                [pick(upper_limit, i, float("inf")) for i in range(c)],
                dtype=jnp.float32)
            self.learned = _clamp_perchannel_pallas(self.learned, lo_arr, hi_arr)
        else:
            lo = None if lower_limit is None else float(lower_limit)
            hi = None if upper_limit is None else float(upper_limit)
            self.learned = _clamp_pallas(self.learned, lo=lo, hi=hi)

    # -- optimizer state helpers --
    def _get_current_state_copy(self):
        return self.clone_image()

    def _set_current_state(self, prior_state):
        self.learned = prior_state

    def _blend_with_prior_state(self, prior_state, fraction):
        self.learned = _lerp_pallas(self.learned, prior_state, float(fraction))

    # -- misc bookkeeping (no compute) --
    def get_image(self):
        return self.forward()

    def clone_image(self):
        return self.forward()

    def clear_auxiliary_data(self):
        self.loss_value = math.nan
        self.pooling_loss_image = None
        self.blame_image = None
        self.statgroup_loss_images = None

    def set_loss_value(self, value):
        self.loss_value = value

    def set_pooling_loss_image(self, image):
        self.pooling_loss_image = image

    def set_blame_image(self, image):
        self.blame_image = image

    def set_statgroup_loss_images(self, statgroupdict):
        self.statgroup_loss_images = statgroupdict

    # TODO(synk): clamp_range_gradients_ operates on autograd .grad buffers,
    # which have no direct equivalent in this forward-only port.


# ----------------------------------- main -------------------------------------

if __name__ == "__main__":
    key = jax.random.PRNGKey(0)
    k1, k2, k3 = jax.random.split(key, 3)

    # small NCHW image, batch=2, channels=4, spatial=16x16
    seed_image = jax.random.uniform(k1, (2, 4, 16, 16), dtype=jnp.float32)

    model = MetamerImage(seed_image)

    # forward pass: pure parameter read
    out = model()
    jax.block_until_ready(out)
    assert out.shape == (2, 4, 16, 16)
    assert jnp.array_equal(out, seed_image), "forward() must return the learned image"

    # freeze kernel (masked copy) vs jnp reference
    target = jax.random.uniform(k2, (2, 4, 16, 16), dtype=jnp.float32)
    mask = jax.random.bernoulli(k3, 0.5, (2, 4, 16, 16))
    model.copy_and_freeze_pixels_(target, mask)
    ref = jnp.where(mask, target, seed_image)
    assert jnp.allclose(model(), ref)

    # scalar clamp kernel
    model.clamp_range_(0.25, 0.75)
    ref = jnp.clip(ref, 0.25, 0.75)
    assert jnp.allclose(model(), ref)

    # per-channel clamp: single Pallas launch, channel axis on the grid
    lo_list = [0.3, None, 0.4, 0.35]
    hi_list = [0.7, 0.6, None, 0.65]
    model.clamp_range_(lo_list, hi_list)
    ref_chans = []
    for i in range(4):
        c = ref[:, i:i + 1]
        if lo_list[i] is not None:
            c = jnp.maximum(c, lo_list[i])
        if hi_list[i] is not None:
            c = jnp.minimum(c, hi_list[i])
        ref_chans.append(c)
    ref = jnp.concatenate(ref_chans, axis=1)
    assert jnp.allclose(model(), ref)

    # fused freeze + clamp (single HBM pass)
    model2 = MetamerImage(seed_image)
    model2.copy_and_freeze_pixels_(target, mask, lower_limit=0.2, upper_limit=0.8)
    ref2 = jnp.clip(jnp.where(mask, target, seed_image), 0.2, 0.8)
    assert jnp.allclose(model2(), ref2)

    # blend (lerp) kernel: fraction is a runtime scalar (no recompile per value)
    prior = model2.clone_image()
    model2._set_current_state(seed_image)
    model2._blend_with_prior_state(prior, 0.25)
    ref3 = seed_image + 0.25 * (prior - seed_image)
    final = model2()
    jax.block_until_ready(final)
    assert jnp.allclose(final, ref3)

    print("KERNEL_OK")
</pallas_src>

<mosaic_0001>
module attributes {stable_mosaic.version = 11 : i64} {
  func.func @kernel(%arg0: i32, %arg1: memref<4x512xi8, #tpu.memory_space<vmem>>, %arg2: memref<4x512xf32, #tpu.memory_space<vmem>>, %arg3: memref<4x512xf32, #tpu.memory_space<vmem>>, %arg4: memref<4x512xf32, #tpu.memory_space<vmem>>) attributes {dimension_semantics = [#tpu.dimension_semantics<parallel>], iteration_bounds = array<i64: 1>, scalar_prefetch = 0 : i64, scratch_operands = 0 : i64, tpu.core_type = #tpu.core_type<tc>, window_params = [{transform_indices = @transform_0, window_bounds = array<i64: 4, 512>}, {transform_indices = @transform_1, window_bounds = array<i64: 4, 512>}, {transform_indices = @transform_2, window_bounds = array<i64: 4, 512>}, {transform_indices = @transform_3, window_bounds = array<i64: 4, 512>}]} {
    %c0 = arith.constant 0 : index
    %c0_0 = arith.constant 0 : index
    %0 = vector.load %arg1[%c0, %c0_0] : memref<4x512xi8, #tpu.memory_space<vmem>>, vector<4x512xi8>
    %c0_i8 = arith.constant 0 : i8
    %1 = vector.broadcast %c0_i8 : i8 to vector<4x512xi8>
    %2 = arith.cmpi ne, %0, %1 : vector<4x512xi8>
    %c0_1 = arith.constant 0 : index
    %c0_2 = arith.constant 0 : index
    %3 = vector.load %arg2[%c0_1, %c0_2] : memref<4x512xf32, #tpu.memory_space<vmem>>, vector<4x512xf32>
    %c0_3 = arith.constant 0 : index
    %c0_4 = arith.constant 0 : index
    %4 = vector.load %arg3[%c0_3, %c0_4] : memref<4x512xf32, #tpu.memory_space<vmem>>, vector<4x512xf32>
    %5 = arith.select %2, %3, %4 : vector<4x512xi1>, vector<4x512xf32>
    %c0_5 = arith.constant 0 : index
    %c0_6 = arith.constant 0 : index
    %6 = vector.load %arg4[%c0_5, %c0_6] : memref<4x512xf32, #tpu.memory_space<vmem>>, vector<4x512xf32>
    tpu.vector_store %arg4[%c0_5, %c0_6], %5 {strides = array<i32>} : memref<4x512xf32, #tpu.memory_space<vmem>>, vector<4x512xf32>,
    return
  }
  func.func @transform_0(%arg0: i32) -> (i32, i32) {
    %c0_i32 = arith.constant 0 : i32
    %c0_i32_0 = arith.constant 0 : i32
    return %arg0, %c0_i32 : i32, i32
  }
  func.func @transform_1(%arg0: i32) -> (i32, i32) {
    %c0_i32 = arith.constant 0 : i32
    %c0_i32_0 = arith.constant 0 : i32
    return %arg0, %c0_i32 : i32, i32
  }
  func.func @transform_2(%arg0: i32) -> (i32, i32) {
    %c0_i32 = arith.constant 0 : i32
    %c0_i32_0 = arith.constant 0 : i32
    return %arg0, %c0_i32 : i32, i32
  }
  func.func @transform_3(%arg0: i32) -> (i32, i32) {
    %c0_i32 = arith.constant 0 : i32
    %c0_i32_0 = arith.constant 0 : i32
    return %arg0, %c0_i32 : i32, i32
  }
}

</mosaic_0001>

<bundles_post_ra>
// kernel: _freeze_pallas.1
= control target key start
LH: loop header
LB: loop body
LE: loop exit
PB: predicated region body
PF: predicated region fallthrough
CT: control target
= control target key end

     0   :  { %v36_v2 = vmov 0   ;;  %s78_s0 = inlined_call_operand.vmem [shape: s8[4,512], index: 0, kind: input, shape index: {}]   ;;  %s79_s1 = inlined_call_operand.vmem [shape: f32[4,512], index: 1, kind: input, shape index: {}]   ;;  %s80_s2 = inlined_call_operand.vmem [shape: f32[4,512], index: 2, kind: input, shape index: {}]   ;;  %s81_s3 = inlined_call_operand.vmem [shape: f32[4,512], index: 3, kind: output, shape index: {}]  }
   0x1   :  { %v16_v0 = vld [vmem:[%s78_s0] sm:$0xf]  ;;  %v19_v6 = vld [vmem:[%s79_s1 + $0x8] sm:$0xff] }
   0x2   :  { %vm17_vm0 = vnez %v16_v0  ;;  %v18_v1 = vld [vmem:[%s79_s1] sm:$0xff]  ;;  %v21_v7 = vld [vmem:[%s80_s2 + $0x8] sm:$0xff] }
   0x3   :  { %v22_v3 = vsel %vm17_vm0, 16843009, %v36_v2  ;;  %v20_v4 = vld [vmem:[%s80_s2] sm:$0xff] }
   0x4   :  { %v23_v5 = vunpack.c.0.s8 %v22_v3  ;;  %v24_v8 = vunpack.c.1.s8 %v22_v3 }
   0x6   :  { %vm25_vm1 = vcmp.ne.s32.totalorder %v23_v5, 0  ;;  %vm26_vm2 = vcmp.ne.s32.totalorder %v24_v8, 0 }
   0x7   :  { %v27_v9 = vsel %vm25_vm1, %v18_v1, %v20_v4  ;;  %v28_v10 = vsel %vm26_vm2, %v19_v6, %v21_v7 }
   0x8   :  { %29 = vst [vmem:[%s81_s3] sm:$0xff] %v27_v9 }
   0x9   :  { %30 = vst [vmem:[%s81_s3 + $0x8] sm:$0xff] %v28_v10 }

</bundles_post_ra>
